<compile_context>
chip_gen: v6e
topology: v6e:2x2x1
jax: 0.10.0
libtpu: 0.0.40
codegen_flags: <defaults>
</compile_context>

<pallas_src>
import functools

import jax
import jax.numpy as jnp
from jax.experimental import pallas as pl
from jax.experimental.pallas import tpu as pltpu


def _instr_cond_kernel(instr_ref, w_ref, p_ref, ft_ref, o_ref, *,
                       eps: float, inv_d: float):
  """One grid step == (one batch sample, one H*W tile).

  instr_ref: (1, 1, I)    selected instruction vector instr[b, :, 0]
  w_ref:     (D, I)       Linear weight, PyTorch layout (out_features, in_features)
  p_ref:     (D, 3)       columns: [linear bias, LN gamma, LN beta]
  ft_ref:    (1, D, Thw)  feature-map tile (channels on sublanes, H*W on lanes)
  o_ref:     (1, D, Thw)  output tile
  """
  # nn.Linear applied to instr[:, :, 0].long(): mimic the integer cast with a
  # trunc-toward-zero, then treat the values as float features.
  x = jnp.trunc(instr_ref[0].astype(jnp.float32))             # (1, I)
  w = w_ref[...].astype(jnp.float32)                          # (D, I)
  p = p_ref[...].astype(jnp.float32)                          # (D, 3)

  # Embedding: emb[d] = sum_i w[d, i] * x[i] + b[d].  Hidden stays on the
  # sublane axis so the later broadcast against (D, Thw) needs no relayout.
  emb = jnp.sum(w * x, axis=1, keepdims=True) + p[:, 0:1]     # (D, 1)

  # LayerNorm over hidden: one-pass fused statistics (biased var, clamped >= 0).
  s = jnp.sum(emb)
  ss = jnp.sum(emb * emb)
  mean = s * inv_d
  var = jnp.maximum(ss * inv_d - mean * mean, 0.0)
  emb = (emb - mean) * jax.lax.rsqrt(var + eps)
  emb = emb * p[:, 1:2] + p[:, 2:3]                           # (D, 1)

  # Broadcast multiply: (1, D, Thw) * (1, D, 1).  Thw is a multiple of 128
  # whenever H*W is, so stores are unmasked and lane-dense, and the result is
  # already in NCHW-flat layout (no wrapper transpose afterwards).
  o_ref[...] = (ft_ref[...] * emb[None, :, :]).astype(o_ref.dtype)


def _hw_tile(hw: int, cap: int = 2048) -> int:
  """Largest H*W tile <= cap that divides H*W (prefer multiples of 128)."""
  if hw <= cap:
    return hw
  t = cap - cap % 128
  while t >= 128:
    if hw % t == 0:
      return t
    t -= 128
  for t in range(cap, 0, -1):
    if hw % t == 0:
      return t
  return hw


def instr_cond_forward(ft, instr, weight, bias, gamma, beta, *, eps: float = 1e-5):
  """Pallas InstrCond forward.

  ft:     (B, 1, D, H, W)
  instr:  (B, 1, K, I)
  weight: (D, I)   nn.Linear weight (out_features, in_features)
  bias, gamma, beta: (D,)
  returns (B, 1, D, H, W)
  """
  B, S, D, H, W = ft.shape
  assert S == 1, "einops 'b 1 d -> b 1 d h w' pins the sequence axis to 1"
  # TODO(synk): support a non-singleton history axis by folding S into the grid.
  Dw, I = weight.shape
  assert Dw == D
  HW = H * W

  instr_sel = instr[:, :, 0]                    # (B, 1, I); .long() trunc happens in-kernel
  ft_flat = ft.reshape(B, D, HW)                # free reshape: native NCHW-flat layout
  params = jnp.stack([bias, gamma, beta], axis=1)   # (D, 3): one DMA instead of three

  thw = _hw_tile(HW)
  nhw = HW // thw

  kernel = functools.partial(_instr_cond_kernel, eps=eps, inv_d=1.0 / D)

  itemsize = jnp.dtype(ft.dtype).itemsize
  flops = int(B) * (2 * D * I + 8 * D + D * HW)
  bytes_accessed = (2 * B * D * HW) * itemsize + (instr_sel.size + weight.size
                                                  + params.size) * 4

  out_flat = pl.pallas_call(
      kernel,
      out_shape=jax.ShapeDtypeStruct((B, D, HW), ft.dtype),
      grid_spec=pltpu.PrefetchScalarGridSpec(
          num_scalar_prefetch=0,
          grid=(B, nhw),
          in_specs=[
              pl.BlockSpec((1, 1, I), lambda b, t: (b, 0, 0)),
              pl.BlockSpec((D, I), lambda b, t: (0, 0)),
              pl.BlockSpec((D, 3), lambda b, t: (0, 0)),
              pl.BlockSpec((1, D, thw), lambda b, t: (b, 0, t)),
          ],
          out_specs=pl.BlockSpec((1, D, thw), lambda b, t: (b, 0, t)),
      ),
      compiler_params=pltpu.CompilerParams(
          dimension_semantics=("parallel", "parallel")),
      cost_estimate=pl.CostEstimate(
          flops=flops, transcendentals=int(B), bytes_accessed=bytes_accessed),
  )(instr_sel, weight, params, ft_flat)

  return out_flat.reshape(B, S, D, H, W)


def _reference_forward(ft, instr, weight, bias, gamma, beta, *, eps: float = 1e-5):
  """Plain-JAX reference mirroring the PyTorch InstrCond forward."""
  x = jnp.trunc(instr[:, :, 0])                               # (B, 1, I)  ~ .long()
  emb = x @ weight.T + bias                                   # (B, 1, D)
  mean = jnp.mean(emb, axis=-1, keepdims=True)
  var = jnp.mean((emb - mean) ** 2, axis=-1, keepdims=True)
  emb = (emb - mean) * jax.lax.rsqrt(var + eps)
  emb = emb * gamma + beta
  return ft * emb[:, :, :, None, None]                        # (B, 1, D, H, W)


if __name__ == "__main__":
  # InstrCond(instr_size=8, hidden_size=32); ft is (B, 1, D, 16, 16).
  B, S, K, I = 2, 1, 4, 8
  D, H, W = 32, 16, 16

  key = jax.random.PRNGKey(0)
  kf, ki, kw, kb, kg, kbe = jax.random.split(key, 6)

  ft = jax.random.normal(kf, (B, S, D, H, W), dtype=jnp.float32)
  # Instruction features; spread over several integers so the .long() trunc matters.
  instr = 4.0 * jax.random.normal(ki, (B, S, K, I), dtype=jnp.float32)

  # PyTorch-default-ish init for nn.Linear; non-trivial LayerNorm affine params.
  bound = 1.0 / jnp.sqrt(I)
  weight = jax.random.uniform(kw, (D, I), jnp.float32, -bound, bound)
  bias = jax.random.uniform(kb, (D,), jnp.float32, -bound, bound)
  gamma = 1.0 + 0.1 * jax.random.normal(kg, (D,), jnp.float32)
  beta = 0.1 * jax.random.normal(kbe, (D,), jnp.float32)

  out = instr_cond_forward(ft, instr, weight, bias, gamma, beta)
  out = jax.block_until_ready(out)

  ref = _reference_forward(ft, instr, weight, bias, gamma, beta)
  assert out.shape == (B, S, D, H, W)
  assert jnp.allclose(out, ref, atol=1e-4, rtol=1e-4), "mismatch vs reference"

  print("KERNEL_OK")
</pallas_src>

<mosaic_0001>
module attributes {stable_mosaic.version = 11 : i64} {
  func.func @_instr_cond_kernel(%arg0: i32, %arg1: i32, %arg2: memref<1x1x8xf32, #tpu.memory_space<vmem>>, %arg3: memref<32x8xf32, #tpu.memory_space<vmem>>, %arg4: memref<32x3xf32, #tpu.memory_space<vmem>>, %arg5: memref<1x32x256xf32, #tpu.memory_space<vmem>>, %arg6: memref<1x32x256xf32, #tpu.memory_space<vmem>>) attributes {dimension_semantics = [#tpu.dimension_semantics<parallel>, #tpu.dimension_semantics<parallel>], iteration_bounds = array<i64: 2, 1>, scalar_prefetch = 0 : i64, scratch_operands = 0 : i64, tpu.core_type = #tpu.core_type<tc>, window_params = [{transform_indices = @transform_0, window_bounds = array<i64: 1, 1, 8>}, {pipeline_mode = #tpu.pipeline_mode<synchronous>, transform_indices = @transform_1, window_bounds = array<i64: 32, 8>}, {pipeline_mode = #tpu.pipeline_mode<synchronous>, transform_indices = @transform_2, window_bounds = array<i64: 32, 3>}, {transform_indices = @transform_3, window_bounds = array<i64: 1, 32, 256>}, {transform_indices = @transform_4, window_bounds = array<i64: 1, 32, 256>}]} {
    %c0 = arith.constant 0 : index
    %c0_0 = arith.constant 0 : index
    %c0_1 = arith.constant 0 : index
    %0 = vector.load %arg2[%c0, %c0_0, %c0_1] : memref<1x1x8xf32, #tpu.memory_space<vmem>>, vector<1x1x8xf32>
    %1 = vector.shape_cast %0 : vector<1x1x8xf32> to vector<1x8xf32>
    %cst = arith.constant 0.000000e+00 : f32
    %2 = vector.broadcast %cst : f32 to vector<1x8xf32>
    %3 = arith.cmpf olt, %1, %2 : vector<1x8xf32>
    %4 = math.ceil %1 : vector<1x8xf32>
    %5 = math.floor %1 : vector<1x8xf32>
    %6 = arith.select %3, %4, %5 : vector<1x8xi1>, vector<1x8xf32>
    %c0_2 = arith.constant 0 : index
    %c0_3 = arith.constant 0 : index
    %7 = vector.load %arg3[%c0_2, %c0_3] : memref<32x8xf32, #tpu.memory_space<vmem>>, vector<32x8xf32>
    %c0_4 = arith.constant 0 : index
    %c0_5 = arith.constant 0 : index
    %8 = vector.load %arg4[%c0_4, %c0_5] : memref<32x3xf32, #tpu.memory_space<vmem>>, vector<32x3xf32>
    %9 = vector.broadcast %6 : vector<1x8xf32> to vector<32x8xf32>
    %10 = arith.mulf %7, %9 : vector<32x8xf32>
    %cst_6 = arith.constant dense<0.000000e+00> : vector<32xf32>
    %11 = vector.multi_reduction <add>, %10, %cst_6 [1] : vector<32x8xf32> to vector<32xf32>
    %12 = vector.shape_cast %11 : vector<32xf32> to vector<32x1xf32>
    %13 = vector.extract_strided_slice %8 {offsets = [0, 0], sizes = [32, 1], strides = [1, 1]} : vector<32x3xf32> to vector<32x1xf32>
    %14 = arith.addf %12, %13 : vector<32x1xf32>
    %15 = vector.shape_cast %14 : vector<32x1xf32> to vector<1x32x1xf32>
    %cst_7 = arith.constant dense<0.000000e+00> : vector<1xf32>
    %16 = vector.multi_reduction <add>, %15, %cst_7 [1, 2] : vector<1x32x1xf32> to vector<1xf32>
    %17 = vector.shape_cast %16 : vector<1xf32> to vector<1x1x1xf32>
    %18 = vector.extract %17[0, 0, 0] : f32 from vector<1x1x1xf32>
    %19 = arith.mulf %14, %14 : vector<32x1xf32>
    %20 = vector.shape_cast %19 : vector<32x1xf32> to vector<1x32x1xf32>
    %cst_8 = arith.constant dense<0.000000e+00> : vector<1xf32>
    %21 = vector.multi_reduction <add>, %20, %cst_8 [1, 2] : vector<1x32x1xf32> to vector<1xf32>
    %22 = vector.shape_cast %21 : vector<1xf32> to vector<1x1x1xf32>
    %23 = vector.extract %22[0, 0, 0] : f32 from vector<1x1x1xf32>
    %cst_9 = arith.constant 3.125000e-02 : f32
    %24 = arith.mulf %18, %cst_9 : f32
    %cst_10 = arith.constant 3.125000e-02 : f32
    %25 = arith.mulf %23, %cst_10 : f32
    %26 = arith.mulf %24, %24 : f32
    %27 = arith.subf %25, %26 : f32
    %cst_11 = arith.constant 0.000000e+00 : f32
    %28 = arith.maximumf %27, %cst_11 : f32
    %29 = vector.broadcast %24 : f32 to vector<32x1xf32>
    %30 = arith.subf %14, %29 : vector<32x1xf32>
    %cst_12 = arith.constant 9.99999974E-6 : f32
    %31 = arith.addf %28, %cst_12 : f32
    %32 = math.rsqrt %31 : f32
    %33 = vector.broadcast %32 : f32 to vector<32x1xf32>
    %34 = arith.mulf %30, %33 : vector<32x1xf32>
    %35 = vector.extract_strided_slice %8 {offsets = [0, 1], sizes = [32, 1], strides = [1, 1]} : vector<32x3xf32> to vector<32x1xf32>
    %36 = arith.mulf %34, %35 : vector<32x1xf32>
    %37 = vector.extract_strided_slice %8 {offsets = [0, 2], sizes = [32, 1], strides = [1, 1]} : vector<32x3xf32> to vector<32x1xf32>
    %38 = arith.addf %36, %37 : vector<32x1xf32>
    %c0_13 = arith.constant 0 : index
    %c0_14 = arith.constant 0 : index
    %c0_15 = arith.constant 0 : index
    %39 = vector.load %arg5[%c0_13, %c0_14, %c0_15] : memref<1x32x256xf32, #tpu.memory_space<vmem>>, vector<1x32x256xf32>
    %40 = vector.shape_cast %38 : vector<32x1xf32> to vector<1x32x1xf32>
    %41 = vector.broadcast %40 : vector<1x32x1xf32> to vector<1x32x256xf32>
    %42 = arith.mulf %39, %41 : vector<1x32x256xf32>
    %c0_16 = arith.constant 0 : index
    %c0_17 = arith.constant 0 : index
    %c0_18 = arith.constant 0 : index
    %43 = vector.load %arg6[%c0_16, %c0_17, %c0_18] : memref<1x32x256xf32, #tpu.memory_space<vmem>>, vector<1x32x256xf32>
    tpu.vector_store %arg6[%c0_16, %c0_17, %c0_18], %42 {strides = array<i32>} : memref<1x32x256xf32, #tpu.memory_space<vmem>>, vector<1x32x256xf32>,
    return
  }
  func.func @transform_0(%arg0: i32, %arg1: i32) -> (i32, i32, i32) {
    %c0_i32 = arith.constant 0 : i32
    %c0_i32_0 = arith.constant 0 : i32
    %c0_i32_1 = arith.constant 0 : i32
    return %arg0, %c0_i32, %c0_i32_0 : i32, i32, i32
  }
  func.func @transform_1(%arg0: i32, %arg1: i32) -> (i32, i32) {
    %c0_i32 = arith.constant 0 : i32
    %c0_i32_0 = arith.constant 0 : i32
    %c0_i32_1 = arith.constant 0 : i32
    return %c0_i32, %c0_i32_0 : i32, i32
  }
  func.func @transform_2(%arg0: i32, %arg1: i32) -> (i32, i32) {
    %c0_i32 = arith.constant 0 : i32
    %c0_i32_0 = arith.constant 0 : i32
    %c0_i32_1 = arith.constant 0 : i32
    return %c0_i32, %c0_i32_0 : i32, i32
  }
  func.func @transform_3(%arg0: i32, %arg1: i32) -> (i32, i32, i32) {
    %c0_i32 = arith.constant 0 : i32
    %c0_i32_0 = arith.constant 0 : i32
    return %arg0, %c0_i32, %arg1 : i32, i32, i32
  }
  func.func @transform_4(%arg0: i32, %arg1: i32) -> (i32, i32, i32) {
    %c0_i32 = arith.constant 0 : i32
    %c0_i32_0 = arith.constant 0 : i32
    return %arg0, %c0_i32, %arg1 : i32, i32, i32
  }
}

</mosaic_0001>

<bundles_post_ra>
// kernel: tpu_custom_call.1
= control target key start
LH: loop header
LB: loop body
LE: loop exit
PB: predicated region body
PF: predicated region fallthrough
CT: control target
= control target key end

     0   :  { %9 = vsyncpa [#allocation3], 0  ;;  %s1001_s0 = inlined_call_operand.vmem [shape: f32[2,1,8], index: 0, kind: input, shape index: {}]   ;;  %s1002_s1 = inlined_call_operand.vmem [shape: f32[32,8], index: 1, kind: input, shape index: {}]   ;;  %s1003_s2 = inlined_call_operand.vmem [shape: f32[32,3], index: 2, kind: input, shape index: {}]   ;;  %s1004_s3 = inlined_call_operand.hbm [shape: f32[2,32,256], index: 3, kind: input, shape index: {}]   ;;  %s1005_s4 = inlined_call_operand.hbm [shape: f32[2,32,256], index: 4, kind: output, shape index: {}]  }
   0x1   :  { %11 = vsyncpa [#allocation3 + $0x1], 0 }
   0x2   :  { %12 = vsyncpa [#allocation4], 0 }
   0x3   :  { %14 = vsyncpa [#allocation4 + $0x1], 0  ;;  %s780_s15 = smov 0   ;;  %s782_s16 = smov 0  }
   0x4   :  { %s784_s17 = smov 0   ;;  %s786_s18 = smov 0  }
   0x5   :  { %s788_s19 = smov 0   ;;  %s790_s20 = smov 0  }
   0x6 LB: > { %s538_s21 = sadd.s32 4294967295, %s743_s20   ;;  %s539_s22 = sadd.s32 4294967294, %s743_s20   ;;  %s743_s20 = sphi %s790_s20, %s20_s20   ;;  %s739_s19 = sphi %s788_s19, %s1016_s19   ;;  %s735_s18 = sphi %s786_s18, %s1015_s18   ;;  %s731_s17 = sphi %s784_s17, %s1014_s17   ;;  %s727_s16 = sphi %s782_s16, %s1013_s16   ;;  %s723_s15 = sphi %s780_s15, %s1012_s15  }
   0x7   : > { %s32_s23 = sadd.s32 1, %s739_s19  ;;  %s109_s24 = sadd.s32 1, %s731_s17 }
   0x8   : > { %p34_p0 = scmp.ge.s32.totalorder %s32_s23, 2  ;;  %p116_p1 = scmp.ne.s32.totalorder %s731_s17, %s727_s16 }
   0x9   : > { %p117_p2 = scmp.eq.s32.totalorder %s743_s20, 0  ;;  %p122_p3 = scmp.ne.s32.totalorder %s727_s16, %s723_s15 }
   0xa   : > { %s1018_s23 = smov (%p34_p0, %s32_s23), 0  ;;  %p123_p5 = scmp.eq.s32.totalorder %s538_s21, 0 }
   0xb   : > { %p821_p4 = por %p117_p2, %p116_p1  ;;  %s104_s26 = ssub.s32 %s739_s19, %s1018_s23 }
   0xc   : > { %p148_p6 = scmp.eq.s32.totalorder %s538_s21, 1  ;;  %p107_p7 = scmp.eq.s32.totalorder %s104_s26, 0 }
   0xd   : > { %p827_p8 = por %p123_p5, %p122_p3  ;;  %p154_p10 = scmp.eq.s32.totalorder %s539_s22, 1 }
   0xe   : > { %p831_p9 = por %p148_p6, %p116_p1  ;;  %p573_p13 = scmp.lt.s32.totalorder %s743_s20, 2 }
   0xf   : > { %s836_s29 = scalar_select %p107_p7, %s731_s17, %s109_s24  }
  0x10   : > { %p838_p11 = por %p154_p10, %p122_p3  ;;  %s186_s5 = sand.u32 1, %s731_s17  }
  0x11   : > { %s542_s6 = sshll.u32 %s186_s5, 6  ;;  %s553_s7 = sshll.u32 %s739_s19, 10 }
  0x12   : > { %s198_s10 = scalar_lea.hbm %s1004_s3, %s553_s7  ;;  %s190_s11 = scalar_lea.vmem [#allocation2], %s542_s6 }
  0x13   : > { %s199_s12 = sshll.u32 %s190_s11, 4  ;;  %p851_p0 = pnand %p573_p13, %p821_p4  ;;  %s200_s12 = int_to_ptr.vmem [resolvable:$true] %s199_s12 }
  0x14   : > { %p545_p1 = scmp.ge.s32.totalorder %s743_s20, 1  ;;  %s187_s14 = scalar_lea.sflag [#allocation3], %s186_s5 }
  0x15   : > { %p637_p2 = pneg %p851_p0  ;;  %s648_s21 = scalar_lea.vmem %s200_s12, 1024 }
  0x16   : > { %p649_p3 = scmp.ne.s32.totalorder %s200_s12, %s648_s21  ;;  %s745_s22 = smov [#allocation2]  }
  0x17   : > { %s653_s24 = sshll.u32 %s745_s22, 4  ;;  %s654_s24 = int_to_ptr.vmem [resolvable:$false] %s653_s24 }
  0x18   : > { %p651_p5 = pnand %p649_p3, %p637_p2  ;;  %s655_s26 = scalar_lea.vmem %s654_s24, 2048 }
  0x19   : > { %p656_p7 = scmp.lt.s32.totalorder %s200_s12, %s654_s24  ;;  %p657_p10 = scmp.lt.s32.totalorder %s655_s26, %s648_s21 }
  0x1a   : > { %p652_p6 = pneg %p651_p5 }
  0x1b   : > { %p658_p12 = por %p657_p10, %p656_p7 }
  0x1d   : > { %p659_p4 = pnand %p658_p12, %p652_p6 }
  0x1f   : > { %662 = shalt.err (!%p659_p4)
}
  0x20   : > { %s746_s25 = smov 256   ;;  %s747_s5 = smov 16  }
  0x21   : > { %568 = dma.hbm_to_vmem [thread:$0]  (!%p851_p0), %s198_s10, 1024, %s200_s12, %s187_s14, %s746_s25, %s746_s25, %s747_s5  }
  0x22   : > { %p207_p13 = scmp.lt.s32.totalorder %s743_s20, 3 }
  0x24   : > { %p208_p2 = pnand %p545_p1, %p207_p13 }
  0x25   : > { %s864_s6 = sand.u32 (!%p208_p2), 1, %s727_s16  }
  0x26   : > { %211 = sbr.rel (%p208_p2) target bundleno = 636 (0x27c), region = 36  ;;  %s546_s7 = sshll.u32 (!%p208_p2), %s864_s6, 6 }
  0x27   : > { %s214_s8 = scalar_lea.sflag (!%p208_p2), [#allocation3], %s864_s6  ;;  %s870_s9 = scalar_lea.vmem (!%p208_p2), [#allocation2], %s546_s7 }
  0x2b   : > { %714 = dma.done.wait (%p827_p8), %s214_s8, 1024  }
  0x2c   : > { %716 = vsyncadd (%p827_p8), %s214_s8, 4294966272  ;;  %p245_p12 = scmp.lt.s32.totalorder %s735_s18, 1  ;;  %v264_v0 = vlaneseq  ;;  %v255_v6 = vld [vmem:[%s1002_s1] sm:$0xff]  ;;  %v257_v8 = vld [vmem:[%s1002_s1 + $0x10] sm:$0xff]  ;;  %vm273_vm1 = vcmask 64512   ;;  %vm290_vm2 = vcmask 7168  }
  0x2d   : > { %v256_v9 = vld [vmem:[%s1002_s1 + $0x8] sm:$0xff]  ;;  %v258_v10 = vld [vmem:[%s1002_s1 + $0x18] sm:$0xff]  ;;  %v259_v20 = vld [vmem:[%s1003_s2] sm:$0xff]  ;;  %s748_s22 = smov 127   ;;  %s749_s24 = smov 126  }
  0x2e   : > { %s246_s10 = scalar_select %p245_p12, %s735_s18, 1  ;;  %v265_v1 = vshrl.u32 %v264_v0, 7  ;;  %v261_v22 = vld [vmem:[%s1003_s2 + $0x10] sm:$0xff]  ;;  %v260_v25 = vld [vmem:[%s1003_s2 + $0x8] sm:$0xff]  ;;  %v262_v26 = vld [vmem:[%s1003_s2 + $0x18] sm:$0xff]  ;;  %v750_v0 = vmov 0  }
  0x2f   : > { %632 = vset.pattern.permute.xlu1 %v750_v0  ;;  %631 = vset.pattern.permute.xlu0 %v750_v0  ;;  %s751_s12 = smov 0.0   ;;  %s244_s27 = scalar_lea.vmem [#allocation5], %s546_s7 }
  0x30   : > { %s247_s13 = scalar_lea.vmem %s1001_s0, %s246_s10  ;;  %v266_v3 = vsub.s32 0, %v265_v1 }
  0x31   : > { %v250_v2 = vld [vmem:[%s247_s13] sm:$0x1] }
  0x32   : > { %vm251_vm0 = vcmp.lt.f32.partialorder %v250_v2, 0.0  ;;  %v252_v4 = vceil.f32 %v250_v2  ;;  %v253_v5 = vfloor.f32 %v250_v2 }
  0x34   : > { %v254_v7 = vsel %vm251_vm0, %v252_v4, %v253_v5 }
  0x35   : > { %v267_v11 = vrot.slane %v254_v7, %v266_v3 }
  0x37   : > { %v269_v12 = vmul.f32 %v267_v11, %v255_v6  ;;  %v271_v13 = vmul.f32 %v267_v11, %v257_v8  ;;  %v270_v14 = vmul.f32 %v267_v11, %v256_v9  ;;  %v272_v15 = vmul.f32 %v267_v11, %v258_v10 }
  0x39   : > { %v274_v16 = vsel %vm273_vm1, %v269_v12, 0.0  ;;  %v280_v17 = vsel %vm273_vm1, %v271_v13, 0.0  ;;  %v277_v18 = vsel %vm273_vm1, %v270_v14, 0.0  ;;  %v283_v19 = vsel %vm273_vm1, %v272_v15, 0.0 }
  0x3a   : > { %275 = vadd.xlane.f32.xlu0 %v274_v16  ;;  %281 = vadd.xlane.f32.xlu1 %v280_v17 }
  0x3e   : > { %278 = vadd.xlane.f32.xlu0 %v277_v18  ;;  %284 = vadd.xlane.f32.xlu1 %v283_v19 }
  0xc3   : > { %v276_v21 = vpop.xlane.xlu0 %275  ;;  %v282_v23 = vpop.xlane.xlu1 %281 }
  0xc4   : > { %v899_v24 = vadd.f32 %v276_v21, %v259_v20  ;;  %v907_v27 = vadd.f32 %v282_v23, %v261_v22 }
  0xc6   : > { %v307_v30 = vmul.f32 %v899_v24, %v899_v24  ;;  %v291_v33 = vsel %vm290_vm2, %v899_v24, 0.0  ;;  %v309_v34 = vmul.f32 %v907_v27, %v907_v27  ;;  %v294_v39 = vsel %vm290_vm2, %v907_v27, 0.0 }
  0xc7   : > { %v279_v28 = vpop.xlane.xlu0 %278  ;;  %v285_v29 = vpop.xlane.xlu1 %284 }
  0xc8   : > { %v911_v31 = vadd.f32 %v279_v28, %v260_v25  ;;  %v913_v32 = vadd.f32 %v285_v29, %v262_v26  ;;  %v311_v41 = vsel %vm290_vm2, %v307_v30, 0.0  ;;  %v314_v45 = vsel %vm290_vm2, %v309_v34, 0.0  ;;  %v384_v29 = vld [vmem:[%s870_s9 + $0x10] sm:$0xff]  ;;  %v385_v30 = vld [vmem:[%s870_s9 + $0x18] sm:$0xff] }
  0xca   : > { %v292_v35 = vsel %vm290_vm2, %v911_v31, 0.0  ;;  %v308_v36 = vmul.f32 %v911_v31, %v911_v31  ;;  %v310_v37 = vmul.f32 %v913_v32, %v913_v32  ;;  %v296_v40 = vsel %vm290_vm2, %v913_v32, 0.0 }
  0xcb   : > { %v293_v38 = vadd.f32 %v292_v35, %v291_v33 }
  0xcc   : > { %v312_v42 = vsel %vm290_vm2, %v308_v36, 0.0  ;;  %v316_v46 = vsel %vm290_vm2, %v310_v37, 0.0 }
  0xcd   : > { %v295_v43 = vadd.f32 %v294_v39, %v293_v38  ;;  %v313_v44 = vadd.f32 %v312_v42, %v311_v41  ;;  %v386_v39 = vld [vmem:[%s870_s9 + $0x20] sm:$0xff]  ;;  %v388_v41 = vld [vmem:[%s870_s9 + $0x30] sm:$0xff]  ;;  %v389_v42 = vld [vmem:[%s870_s9 + $0x38] sm:$0xff] }
  0xcf   : > { %v297_v47 = vadd.f32 %v296_v40, %v295_v43  ;;  %v315_v48 = vadd.f32 %v314_v45, %v313_v44  ;;  %v387_v40 = vld [vmem:[%s870_s9 + $0x28] sm:$0xff] }
  0xd1   : > { %298 = vadd.xlane.f32.xlu0 %v297_v47  ;;  %v317_v49 = vadd.f32 %v316_v46, %v315_v48 }
  0xd3   : > { %318 = vadd.xlane.f32.xlu1 %v317_v49 }
  0xe4   : > { %352 = vrot.lane.b32.xlu1 %v260_v25, %s748_s22 }
  0xe7   : > { %350 = vrot.lane.b32.xlu0 %v259_v20, %s748_s22 }
  0xe8   : > { %354 = vrot.lane.b32.xlu1 %v261_v22, %s748_s22 }
  0xeb   : > { %366 = vrot.lane.b32.xlu0 %v259_v20, %s749_s24 }
  0xec   : > { %356 = vrot.lane.b32.xlu1 %v262_v26, %s748_s22  ;;  %s442_s22 = sshll.u32 %s244_s27, 4  ;;  %s948_s22 = int_to_ptr.vmem [resolvable:$true] %s442_s22 }
  0xef   : > { %370 = vrot.lane.b32.xlu0 %v261_v22, %s749_s24 }
  0xf0   : > { %368 = vrot.lane.b32.xlu1 %v260_v25, %s749_s24 }
  0xf4   : > { %372 = vrot.lane.b32.xlu1 %v262_v26, %s749_s24  ;;  %s554_s24 = sshll.u32 %s735_s18, 10  ;;  %s427_s18 = scalar_lea.sflag [#allocation4], %s864_s6 }
 0x15a   : > { %v299_v50 = vpop.xlane.xlu0 %298 }
 0x15b   : > { %v300_v51 = vrot.slane %v299_v50, 4 }
 0x15c   : > { %v319_v52 = vpop.xlane.xlu1 %318 }
 0x15d   : > { %v301_v53 = vadd.f32 %v300_v51, %v299_v50  ;;  %v320_v54 = vrot.slane %v319_v52, 4 }
 0x15e   : > { %v351_v6 = vpop.permute.xlu0 %350 }
 0x15f   : > { %v302_v55 = vrot.slane %v301_v53, 2  ;;  %v321_v56 = vadd.f32 %v320_v54, %v319_v52 }
 0x160   : > { %v353_v3 = vpop.permute.xlu1 %352 }
 0x161   : > { %v322_v57 = vrot.slane %v321_v56, 2  ;;  %v303_v58 = vadd.f32 %v302_v55, %v301_v53 }
 0x162   : > { %v367_v14 = vpop.permute.xlu0 %366 }
 0x163   : > { %v304_v59 = vrot.slane %v303_v58, 1  ;;  %v323_v60 = vadd.f32 %v322_v57, %v321_v56 }
 0x164   : > { %v355_v4 = vpop.permute.xlu1 %354 }
 0x165   : > { %v305_v61 = vadd.f32 %v304_v59, %v303_v58  ;;  %v324_v62 = vrot.slane %v323_v60, 1 }
 0x166   : > { %v371_v26 = vpop.permute.xlu0 %370 }
 0x167   : > { %555 = vpush %v305_v61  ;;  %v325_v63 = vadd.f32 %v324_v62, %v323_v60 }
 0x168   : > { %v357_v5 = vpop.permute.xlu1 %356 }
 0x169   : > { %557 = vpush %v325_v63 }
 0x16c   : > { %v369_v13 = vpop.permute.xlu1 %368 }
 0x170   : > { %v373_v25 = vpop.permute.xlu1 %372 }
 0x198   : > { %s556_s26 = spop %555 }
 0x199   : > { %s327_s25 = smul.f32 0.03125, %s556_s26 }
 0x19a   : > { %s558_s5 = spop %557 }
 0x19b   : > { %s329_s8 = smul.f32 %s327_s25, %s327_s25  ;;  %v332_v7 = vstv %s327_s25  ;;  %s953_s25 = scalar_lea.hbm %s1005_s4, %s554_s24 }
 0x19c   : > { %s328_s10 = smul.f32 0.03125, %s558_s5  ;;  %v333_v8 = vsub.f32 %v899_v24, %v332_v7  ;;  %v334_v9 = vsub.f32 %v911_v31, %v332_v7  ;;  %v335_v10 = vsub.f32 %v907_v27, %v332_v7  ;;  %v336_v11 = vsub.f32 %v913_v32, %v332_v7  ;;  %v382_v31 = vld [vmem:[%s870_s9] sm:$0xff]  ;;  %v383_v32 = vld [vmem:[%s870_s9 + $0x8] sm:$0xff]  ;;  %s663_s9 = scalar_lea.vmem %s948_s22, 1024 }
 0x19d   : > { %p664_p8 = scmp.ne.s32.totalorder %s948_s22, %s663_s9  ;;  %s752_s5 = smov [#allocation5]  }
 0x19e   : > { %s330_s11 = ssub.f32 %s328_s10, %s329_s8  ;;  %s667_s8 = sshll.u32 %s752_s5, 4  ;;  %s668_s8 = int_to_ptr.vmem [resolvable:$false] %s667_s8 }
 0x19f   : > { %p665_p0 = pnand %p664_p8, %p831_p9  ;;  %s669_s10 = scalar_lea.vmem %s668_s8, 2048 }
 0x1a0   : > { %s331_s13 = smax.f32 %s751_s12, %s330_s11  ;;  %p670_p3 = scmp.lt.s32.totalorder %s948_s22, %s668_s8 }
 0x1a1   : > { %s337_s14 = sadd.f32 1e-05, %s331_s13  ;;  %p666_p1 = pneg %p665_p0 }
 0x1a2   : > { %p671_p5 = scmp.lt.s32.totalorder %s669_s10, %s663_s9 }
 0x1a3   : > { %v338_v1 = vstv %s337_s14 }
 0x1a4   : > { %633 = vrsqrt.f32 %v338_v1  ;;  %p672_p6 = por %p671_p5, %p670_p3 }
 0x1a6   : > { %p673_p7 = pnand %p672_p6, %p666_p1 }
 0x1b1   : > { %v634_v2 = vpop.eup %633 }
 0x1b2   : > { %559 = vpush %v634_v2 }
 0x1e3   : > { %s560_s21 = spop %559 }
 0x1e4   : > { %v341_v12 = vstv %s560_s21 }
 0x1e5   : > { %v342_v15 = vmul.f32 %v341_v12, %v333_v8  ;;  %v343_v16 = vmul.f32 %v341_v12, %v334_v9  ;;  %v344_v17 = vmul.f32 %v341_v12, %v335_v10  ;;  %v345_v18 = vmul.f32 %v341_v12, %v336_v11 }
 0x1e7   : > { %v363_v19 = vmul.f32 %v353_v3, %v343_v16  ;;  %v362_v20 = vmul.f32 %v351_v6, %v342_v15  ;;  %v365_v23 = vmul.f32 %v357_v5, %v345_v18  ;;  %v364_v24 = vmul.f32 %v355_v4, %v344_v17 }
 0x1e9   : > { %v379_v21 = vadd.f32 %v369_v13, %v363_v19  ;;  %v378_v22 = vadd.f32 %v367_v14, %v362_v20  ;;  %v381_v27 = vadd.f32 %v373_v25, %v365_v23  ;;  %v380_v28 = vadd.f32 %v371_v26, %v364_v24 }
 0x1eb   : > { %397 = vperm.xlu1 %632, %v379_v21   ;;  %392 = vperm.xlu0 %631, %v378_v22  }
 0x1ef   : > { %407 = vperm.xlu0 %631, %v381_v27   ;;  %402 = vperm.xlu1 %632, %v380_v28  }
 0x266   : > { %v398_v33 = vpop.permute.xlu1 %397  ;;  %v393_v34 = vpop.permute.xlu0 %392 }
 0x267   : > { %v412_v35 = vmul.f32 %v398_v33, %v384_v29  ;;  %v413_v36 = vmul.f32 %v398_v33, %v385_v30  ;;  %v410_v37 = vmul.f32 %v393_v34, %v382_v31  ;;  %v411_v38 = vmul.f32 %v393_v34, %v383_v32 }
 0x269   : > { %420 = vst [vmem:[%s244_s27 + $0x10] sm:$0xff] %v412_v35  ;;  %421 = vst [vmem:[%s244_s27 + $0x18] sm:$0xff] %v413_v36 }
 0x26a   : > { %418 = vst [vmem:[%s244_s27] sm:$0xff] %v410_v37  ;;  %419 = vst [vmem:[%s244_s27 + $0x8] sm:$0xff] %v411_v38  ;;  %v403_v43 = vpop.permute.xlu1 %402  ;;  %v408_v44 = vpop.permute.xlu0 %407 }
 0x26b   : > { %v414_v45 = vmul.f32 %v403_v43, %v386_v39  ;;  %v415_v46 = vmul.f32 %v403_v43, %v387_v40  ;;  %v416_v47 = vmul.f32 %v408_v44, %v388_v41  ;;  %v417_v48 = vmul.f32 %v408_v44, %v389_v42 }
 0x26d   : > { %422 = vst [vmem:[%s244_s27 + $0x20] sm:$0xff] %v414_v45  ;;  %423 = vst [vmem:[%s244_s27 + $0x28] sm:$0xff] %v415_v46 }
 0x26e   : > { %424 = vst [vmem:[%s244_s27 + $0x30] sm:$0xff] %v416_v47  ;;  %425 = vst [vmem:[%s244_s27 + $0x38] sm:$0xff] %v417_v48 }
 0x26f   : > { %676 = shalt.err (!%p673_p7)
}
 0x270   : > { %s677_s11 = scalar_lea.hbm %s953_s25, 1024  ;;  %s681_s14 = scalar_lea.hbm %s1005_s4, 2048 }
 0x271   : > { %p678_p10 = scmp.ne.s32.totalorder %s953_s25, %s677_s11  ;;  %p682_p2 = scmp.lt.s32.totalorder %s953_s25, %s1005_s4 }
 0x272   : > { %p683_p12 = scmp.lt.s32.totalorder %s681_s14, %s677_s11 }
 0x273   : > { %p679_p4 = pnand %p678_p10, %p831_p9 }
 0x274   : > { %p684_p8 = por %p683_p12, %p682_p2 }
 0x275   : > { %p680_p13 = pneg %p679_p4 }
 0x277   : > { %p685_p0 = pnand %p684_p8, %p680_p13 }
 0x279   : > { %688 = shalt.err (!%p685_p0)
}
 0x27a   : > { %s753_s24 = smov 256   ;;  %s754_s7 = smov 16  }
 0x27b   : > { %563 = dma.vmem_to_hbm [thread:$0]  (%p831_p9), %s948_s22, 1024, %s953_s25, %s427_s18, %s753_s24, %s753_s24, %s754_s7  }
 0x27c PF: > { %s457_s26 = sand.u32 1, %s723_s15   ;;  %p1011_p1 = scmp.ge.s32.totalorder %s743_s20, 2 }
 0x27d   : > { %s458_s9 = scalar_lea.sflag [#allocation4], %s457_s26 }
 0x27e   : > { %p570_p3 = pnand %p1011_p1, %p838_p11 }
 0x280   : > { %p571_p5 = pneg %p570_p3 }
 0x282   : > { %718 = dma.done.wait (%p571_p5), %s458_s9, 1024  }
 0x283   : > { %720 = vsyncadd (%p571_p5), %s458_s9, 4294966272  ;;  %s20_s20 = sadd.s32 1, %s743_s20   ;;  %s1012_s15 = smov %s727_s16 }
 0x284   : > { %p17_p6 = scmp.ge.s32.totalorder %s20_s20, 4   ;;  %s1013_s16 = smov %s731_s17 }
 0x285   : > { %s1014_s17 = smov %s836_s29  ;;  %s1015_s18 = smov %s739_s19 }
 0x286   : > { %s1016_s19 = smov %s1018_s23  ;;  %19 = sbr.rel (!%p17_p6) target bundleno = 6 (0x6), region = 84 }
 0x28b   :  { %463 = vsyncpa [#allocation3], 1 }
 0x28c   :  { %465 = vsyncpa [#allocation3 + $0x1], 1 }
 0x28d   :  { %466 = vsyncpa [#allocation4], 1 }
 0x28e   :  { %468 = vsyncpa [#allocation4 + $0x1], 1 }

</bundles_post_ra>
